<compile_context>
chip_gen: v5e
topology: v5e:2x2
jax: 0.10.0
libtpu: 0.0.40
codegen_flags: <defaults>
</compile_context>

<pallas_src>
import functools

import jax
import jax.numpy as jnp
from jax import lax
from jax.experimental import pallas as pl
from jax.experimental.pallas import tpu as pltpu  # noqa: F401  (TPU backend)

BN_EPS = 1e-5
NPAD = 128          # lane-dense padded width of the final logits


# ----------------------------------------------------------------------------
# Fused Pallas kernel: whole network, one launch, VMEM-resident intermediates.
#
# Activation layout through the kernel:
#   x1w : (B*7, 7*Cin)  rows (b, h), cols (w, cin)
#   y1  : (B*7, 7*Hd)   rows (b, h), cols (w, c)
#   y2  : (B*3, 3*Hd)   rows (b, ho), cols (wo, c)
#   y3  : (B,   Hd)
#   out : (B,   128)    (first num_classes lanes valid)
# ----------------------------------------------------------------------------
def _fused_kernel(x_ref, w1_ref, sh1_ref,
                  sel_kh_ref, w2_ref, sh2_ref,
                  sel_ho_ref, wfc1_ref, sh3_ref,
                  wfc2_ref, bfc2_ref, o_ref):
    f32 = jnp.float32

    # ---- conv1 (1x1) + BN + ReLU (block-diagonal over the 7 w positions) ----
    y1 = jnp.dot(x_ref[...], w1_ref[...], preferred_element_type=f32)
    y1 = jnp.maximum(y1 + sh1_ref[...], 0.0)                       # (B*7, 7*Hd)

    # ---- conv2 (3x3, stride 2) + BN + ReLU --------------------------------
    # Per kernel-row tap kh: a 0/1 selection matmul gathers rows
    # (b, 2*ho + kh) -> (b, ho); the structured weight holds the stride-2 taps
    # along w and the folded BN scale.  Static Python loop => fully unrolled.
    acc = None
    for kh in range(3):
        g = jnp.dot(sel_kh_ref[kh], y1, preferred_element_type=f32)    # (B*3, 7*Hd)
        part = jnp.dot(g, w2_ref[kh], preferred_element_type=f32)      # (B*3, 3*Hd)
        acc = part if acc is None else acc + part
    y2 = jnp.maximum(acc + sh2_ref[...], 0.0)                      # (B*3, 3*Hd)

    # ---- fc1 + BN1d + ReLU -------------------------------------------------
    # The PyTorch (c,h,w) flatten permutation is folded into the per-ho weight
    # chunks; a selection matmul picks row (b, ho).
    acc = None
    for ho in range(3):
        h = jnp.dot(sel_ho_ref[ho], y2, preferred_element_type=f32)    # (B, 3*Hd)
        part = jnp.dot(h, wfc1_ref[ho], preferred_element_type=f32)    # (B, Hd)
        acc = part if acc is None else acc + part
    y3 = jnp.maximum(acc + sh3_ref[...], 0.0)                      # (B, Hd)
    # TODO(synk): Dropout(p=0.5) training-mode masking not implemented
    # (eval identity); would need pltpu.prng_seed / prng_random_bits.

    # ---- fc2 (padded to 128 lanes for an unmasked, lane-dense store) -------
    out = jnp.dot(y3, wfc2_ref[...], preferred_element_type=f32) + bfc2_ref[...]
    o_ref[...] = out.astype(o_ref.dtype)


# ----------------------------------------------------------------------------
# Parameter construction (deterministic, synthetic) and one-time prep/folding.
# ----------------------------------------------------------------------------
def init_params(key, in_channels, hidden, out_classes):
    ks = jax.random.split(key, 18)
    u = lambda k, s, lo=-0.1, hi=0.1: jax.random.uniform(k, s, jnp.float32, lo, hi)
    p = {}
    # conv1: 1x1
    p["w1"] = u(ks[0], (hidden, in_channels, 1, 1))
    p["b1"] = u(ks[1], (hidden,))
    p["bn1"] = dict(gamma=u(ks[2], (hidden,), 0.8, 1.2),
                    beta=u(ks[3], (hidden,)),
                    mean=u(ks[4], (hidden,)),
                    var=jax.random.uniform(ks[5], (hidden,), jnp.float32, 0.5, 1.5))
    # conv2: 3x3 stride 2
    p["w2"] = u(ks[6], (hidden, hidden, 3, 3))
    p["b2"] = u(ks[7], (hidden,))
    p["bn2"] = dict(gamma=u(ks[8], (hidden,), 0.8, 1.2),
                    beta=u(ks[9], (hidden,)),
                    mean=u(ks[10], (hidden,)),
                    var=jax.random.uniform(ks[11], (hidden,), jnp.float32, 0.5, 1.5))
    # fc1: Linear(3*3*hidden -> hidden) + BN1d
    p["wfc1"] = u(ks[12], (hidden, 3 * 3 * hidden))
    p["bfc1"] = u(ks[13], (hidden,))
    p["bn3"] = dict(gamma=u(ks[14], (hidden,), 0.8, 1.2),
                    beta=u(ks[15], (hidden,)),
                    mean=jnp.zeros((hidden,), jnp.float32),
                    var=jnp.ones((hidden,), jnp.float32))
    # fc2: Linear(hidden -> out_classes)
    p["wfc2"] = u(ks[16], (out_classes, hidden))
    p["bfc2"] = u(ks[17], (out_classes,))
    return p


def fold_bn(bias, bn):
    """scale/shift such that y*scale + shift == BN_eval(y + bias)."""
    scale = bn["gamma"] / jnp.sqrt(bn["var"] + BN_EPS)
    shift = bn["beta"] + (bias - bn["mean"]) * scale
    return scale, shift


def prepare_params(p, batch_size):
    """One-time folding of BN, flatten permutation and conv structure."""
    Hd, Cin = p["w1"].shape[0], p["w1"].shape[1]
    NCLS = p["wfc2"].shape[0]
    B = batch_size
    f32 = jnp.float32

    s1, sh1 = fold_bn(p["b1"], p["bn1"])
    s2, sh2 = fold_bn(p["b2"], p["bn2"])
    s3, sh3 = fold_bn(p["bfc1"], p["bn3"])

    # conv1 (1x1) with BN scale folded, block-diagonal over the 7 w positions
    # so the matmul output lands directly in the (rows=(b,h), cols=(w,c)) layout.
    w1f = p["w1"].reshape(Hd, Cin).T * s1[None, :]                  # (Cin, Hd)
    w1_blk = jnp.kron(jnp.eye(7, dtype=f32), w1f)                   # (7*Cin, 7*Hd)
    sh1_t = jnp.tile(sh1, 7).reshape(1, 7 * Hd)

    # conv2: per-kh structured weight with BN scale folded:
    #   W2[kh][w*Hd + ci, wo*Hd + co] = w2[co, ci, kh, w - 2*wo] * s2[co]
    w2s = p["w2"] * s2[:, None, None, None]                         # (co, ci, kh, kw)
    taps = []
    for kh in range(3):
        m = jnp.zeros((7, Hd, 3, Hd), f32)
        for wo in range(3):
            for kw in range(3):
                m = m.at[2 * wo + kw, :, wo, :].set(w2s[:, :, kh, kw].T)  # (ci, co)
        taps.append(m.reshape(7 * Hd, 3 * Hd))
    w2_taps = jnp.stack(taps)                                       # (3, 7Hd, 3Hd)
    sh2_t = jnp.tile(sh2, 3).reshape(1, 3 * Hd)

    # 0/1 selection matrices: stride-2 row gather (per kh) and per-ho row pick.
    eye_b = jnp.eye(B, dtype=f32)
    sel_kh = jnp.stack([
        jnp.kron(eye_b,
                 jnp.zeros((3, 7), f32)
                 .at[jnp.arange(3), 2 * jnp.arange(3) + kh].set(1.0))
        for kh in range(3)])                                        # (3, B*3, B*7)
    sel_ho = jnp.stack([
        jnp.kron(eye_b, jnp.zeros((1, 3), f32).at[0, ho].set(1.0))
        for ho in range(3)])                                        # (3, B, B*3)

    # fc1: BN scale + PyTorch (c,h,w) flatten permutation folded in, split per
    # ho to match y2's (rows=(b,ho), cols=(wo,c)) layout.
    wfc1 = (p["wfc1"] * s3[:, None]).reshape(Hd, Hd, 3, 3)          # (j, c, h, w)
    wfc1_taps = jnp.stack([
        jnp.transpose(wfc1[:, :, ho, :], (2, 1, 0)).reshape(3 * Hd, Hd)
        for ho in range(3)])                                        # (3, 3Hd, Hd)
    sh3_t = sh3.reshape(1, Hd)

    # fc2, zero-padded to a 128-lane-dense output slab.
    wfc2_pad = jnp.zeros((Hd, NPAD), f32).at[:, :NCLS].set(p["wfc2"].T)
    bfc2_pad = jnp.zeros((1, NPAD), f32).at[0, :NCLS].set(p["bfc2"])

    return dict(w1_blk=w1_blk, sh1=sh1_t,
                sel_kh=sel_kh, w2_taps=w2_taps, sh2=sh2_t,
                sel_ho=sel_ho, wfc1_taps=wfc1_taps, sh3=sh3_t,
                wfc2_pad=wfc2_pad, bfc2_pad=bfc2_pad)


# ----------------------------------------------------------------------------
# Forward pass: one pallas_call, tiny layout plumbing in the wrapper.
# ----------------------------------------------------------------------------
@functools.partial(jax.jit, static_argnames=("num_classes",))
def rotation_classifier_forward(x_nchw, prep, *, num_classes):
    B, Cin, H, W = x_nchw.shape
    assert (H, W) == (7, 7)
    # NCHW -> rows (b, h), cols (w, cin), matching the block-diag conv1 weight.
    x1w = jnp.transpose(x_nchw, (0, 2, 3, 1)).reshape(B * 7, 7 * Cin)
    out_pad = pl.pallas_call(
        _fused_kernel,
        out_shape=jax.ShapeDtypeStruct((B, NPAD), jnp.float32),
    )(x1w, prep["w1_blk"], prep["sh1"],
      prep["sel_kh"], prep["w2_taps"], prep["sh2"],
      prep["sel_ho"], prep["wfc1_taps"], prep["sh3"],
      prep["wfc2_pad"], prep["bfc2_pad"])
    return out_pad[:, :num_classes]


# ----------------------------------------------------------------------------
# Pure-JAX reference (lax conv) for a sanity check
# ----------------------------------------------------------------------------
def reference_forward(x, p):
    def bn(y, s):  # y NCHW, per-channel stats
        return ((y - s["mean"][None, :, None, None])
                / jnp.sqrt(s["var"][None, :, None, None] + BN_EPS)
                * s["gamma"][None, :, None, None] + s["beta"][None, :, None, None])

    dn = ("NCHW", "OIHW", "NCHW")
    y = lax.conv_general_dilated(x, p["w1"], (1, 1), "VALID",
                                 dimension_numbers=dn) + p["b1"][None, :, None, None]
    y = jnp.maximum(bn(y, p["bn1"]), 0.0)
    y = lax.conv_general_dilated(y, p["w2"], (2, 2), "VALID",
                                 dimension_numbers=dn) + p["b2"][None, :, None, None]
    y = jnp.maximum(bn(y, p["bn2"]), 0.0)
    flat = y.reshape(y.shape[0], -1)
    z = flat @ p["wfc1"].T + p["bfc1"]
    z = ((z - p["bn3"]["mean"]) / jnp.sqrt(p["bn3"]["var"] + BN_EPS)
         * p["bn3"]["gamma"] + p["bn3"]["beta"])
    z = jnp.maximum(z, 0.0)
    return z @ p["wfc2"].T + p["bfc2"]


if __name__ == "__main__":
    B, Cin, Hd, NCLS = 2, 4, 32, 4
    key = jax.random.PRNGKey(0)
    kx, kp = jax.random.split(key)
    x = jax.random.normal(kx, (B, Cin, 7, 7), jnp.float32)
    params = init_params(kp, Cin, Hd, NCLS)
    prep = prepare_params(params, batch_size=B)

    out = jax.block_until_ready(
        rotation_classifier_forward(x, prep, num_classes=NCLS))
    ref = jax.block_until_ready(reference_forward(x, params))

    assert out.shape == (B, NCLS), out.shape
    assert jnp.allclose(out, ref, atol=1e-4, rtol=1e-4), (out, ref)
    print("KERNEL_OK")
</pallas_src>

<mosaic_0001>
module attributes {stable_mosaic.version = 11 : i64} {
  func.func @_fused_kernel(%arg0: memref<14x28xf32, #tpu.memory_space<vmem>>, %arg1: memref<28x224xf32, #tpu.memory_space<vmem>>, %arg2: memref<1x224xf32, #tpu.memory_space<vmem>>, %arg3: memref<3x6x14xf32, #tpu.memory_space<vmem>>, %arg4: memref<3x224x96xf32, #tpu.memory_space<vmem>>, %arg5: memref<1x96xf32, #tpu.memory_space<vmem>>, %arg6: memref<3x2x6xf32, #tpu.memory_space<vmem>>, %arg7: memref<3x96x32xf32, #tpu.memory_space<vmem>>, %arg8: memref<1x32xf32, #tpu.memory_space<vmem>>, %arg9: memref<32x128xf32, #tpu.memory_space<vmem>>, %arg10: memref<1x128xf32, #tpu.memory_space<vmem>>, %arg11: memref<2x128xf32, #tpu.memory_space<vmem>>) attributes {dimension_semantics = [], scalar_prefetch = 0 : i64, scratch_operands = 0 : i64, tpu.core_type = #tpu.core_type<tc>} {
    %c0 = arith.constant 0 : index
    %c0_0 = arith.constant 0 : index
    %0 = vector.load %arg0[%c0, %c0_0] : memref<14x28xf32, #tpu.memory_space<vmem>>, vector<14x28xf32>
    %c0_1 = arith.constant 0 : index
    %c0_2 = arith.constant 0 : index
    %1 = vector.load %arg1[%c0_1, %c0_2] : memref<28x224xf32, #tpu.memory_space<vmem>>, vector<28x224xf32>
    %cst = arith.constant dense<0.000000e+00> : vector<14x224xf32>
    %2 = tpu.matmul %0, %1, %cst {dimension_numbers = #tpu.dot_dimension_numbers<[1], [0], [0], [1], [0, 0, 1, 1], [], []>} : vector<14x28xf32>, vector<28x224xf32>, vector<14x224xf32> -> vector<14x224xf32>
    %c0_3 = arith.constant 0 : index
    %c0_4 = arith.constant 0 : index
    %3 = vector.load %arg2[%c0_3, %c0_4] : memref<1x224xf32, #tpu.memory_space<vmem>>, vector<1x224xf32>
    %4 = vector.broadcast %3 : vector<1x224xf32> to vector<14x224xf32>
    %5 = arith.addf %2, %4 : vector<14x224xf32>
    %cst_5 = arith.constant 0.000000e+00 : f32
    %6 = vector.broadcast %cst_5 : f32 to vector<14x224xf32>
    %7 = arith.maximumf %5, %6 : vector<14x224xf32>
    %c0_6 = arith.constant 0 : index
    %c0_7 = arith.constant 0 : index
    %c0_8 = arith.constant 0 : index
    %8 = vector.load %arg3[%c0_6, %c0_7, %c0_8] : memref<3x6x14xf32, #tpu.memory_space<vmem>>, vector<1x6x14xf32>
    %9 = vector.shape_cast %8 : vector<1x6x14xf32> to vector<6x14xf32>
    %cst_9 = arith.constant dense<0.000000e+00> : vector<6x224xf32>
    %10 = tpu.matmul %9, %7, %cst_9 {dimension_numbers = #tpu.dot_dimension_numbers<[1], [0], [0], [1], [0, 0, 1, 1], [], []>} : vector<6x14xf32>, vector<14x224xf32>, vector<6x224xf32> -> vector<6x224xf32>
    %c0_10 = arith.constant 0 : index
    %c0_11 = arith.constant 0 : index
    %c0_12 = arith.constant 0 : index
    %11 = vector.load %arg4[%c0_10, %c0_11, %c0_12] : memref<3x224x96xf32, #tpu.memory_space<vmem>>, vector<1x224x96xf32>
    %12 = vector.shape_cast %11 : vector<1x224x96xf32> to vector<224x96xf32>
    %cst_13 = arith.constant dense<0.000000e+00> : vector<6x96xf32>
    %13 = tpu.matmul %10, %12, %cst_13 {dimension_numbers = #tpu.dot_dimension_numbers<[1], [0], [0], [1], [0, 0, 1, 1], [], []>} : vector<6x224xf32>, vector<224x96xf32>, vector<6x96xf32> -> vector<6x96xf32>
    %c1 = arith.constant 1 : index
    %c0_14 = arith.constant 0 : index
    %c0_15 = arith.constant 0 : index
    %14 = vector.load %arg3[%c1, %c0_14, %c0_15] : memref<3x6x14xf32, #tpu.memory_space<vmem>>, vector<1x6x14xf32>
    %15 = vector.shape_cast %14 : vector<1x6x14xf32> to vector<6x14xf32>
    %cst_16 = arith.constant dense<0.000000e+00> : vector<6x224xf32>
    %16 = tpu.matmul %15, %7, %cst_16 {dimension_numbers = #tpu.dot_dimension_numbers<[1], [0], [0], [1], [0, 0, 1, 1], [], []>} : vector<6x14xf32>, vector<14x224xf32>, vector<6x224xf32> -> vector<6x224xf32>
    %c1_17 = arith.constant 1 : index
    %c0_18 = arith.constant 0 : index
    %c0_19 = arith.constant 0 : index
    %17 = vector.load %arg4[%c1_17, %c0_18, %c0_19] : memref<3x224x96xf32, #tpu.memory_space<vmem>>, vector<1x224x96xf32>
    %18 = vector.shape_cast %17 : vector<1x224x96xf32> to vector<224x96xf32>
    %cst_20 = arith.constant dense<0.000000e+00> : vector<6x96xf32>
    %19 = tpu.matmul %16, %18, %cst_20 {dimension_numbers = #tpu.dot_dimension_numbers<[1], [0], [0], [1], [0, 0, 1, 1], [], []>} : vector<6x224xf32>, vector<224x96xf32>, vector<6x96xf32> -> vector<6x96xf32>
    %20 = arith.addf %13, %19 : vector<6x96xf32>
    %c2 = arith.constant 2 : index
    %c0_21 = arith.constant 0 : index
    %c0_22 = arith.constant 0 : index
    %21 = vector.load %arg3[%c2, %c0_21, %c0_22] : memref<3x6x14xf32, #tpu.memory_space<vmem>>, vector<1x6x14xf32>
    %22 = vector.shape_cast %21 : vector<1x6x14xf32> to vector<6x14xf32>
    %cst_23 = arith.constant dense<0.000000e+00> : vector<6x224xf32>
    %23 = tpu.matmul %22, %7, %cst_23 {dimension_numbers = #tpu.dot_dimension_numbers<[1], [0], [0], [1], [0, 0, 1, 1], [], []>} : vector<6x14xf32>, vector<14x224xf32>, vector<6x224xf32> -> vector<6x224xf32>
    %c2_24 = arith.constant 2 : index
    %c0_25 = arith.constant 0 : index
    %c0_26 = arith.constant 0 : index
    %24 = vector.load %arg4[%c2_24, %c0_25, %c0_26] : memref<3x224x96xf32, #tpu.memory_space<vmem>>, vector<1x224x96xf32>
    %25 = vector.shape_cast %24 : vector<1x224x96xf32> to vector<224x96xf32>
    %cst_27 = arith.constant dense<0.000000e+00> : vector<6x96xf32>
    %26 = tpu.matmul %23, %25, %cst_27 {dimension_numbers = #tpu.dot_dimension_numbers<[1], [0], [0], [1], [0, 0, 1, 1], [], []>} : vector<6x224xf32>, vector<224x96xf32>, vector<6x96xf32> -> vector<6x96xf32>
    %27 = arith.addf %20, %26 : vector<6x96xf32>
    %c0_28 = arith.constant 0 : index
    %c0_29 = arith.constant 0 : index
    %28 = vector.load %arg5[%c0_28, %c0_29] : memref<1x96xf32, #tpu.memory_space<vmem>>, vector<1x96xf32>
    %29 = vector.broadcast %28 : vector<1x96xf32> to vector<6x96xf32>
    %30 = arith.addf %27, %29 : vector<6x96xf32>
    %cst_30 = arith.constant 0.000000e+00 : f32
    %31 = vector.broadcast %cst_30 : f32 to vector<6x96xf32>
    %32 = arith.maximumf %30, %31 : vector<6x96xf32>
    %c0_31 = arith.constant 0 : index
    %c0_32 = arith.constant 0 : index
    %c0_33 = arith.constant 0 : index
    %33 = vector.load %arg6[%c0_31, %c0_32, %c0_33] : memref<3x2x6xf32, #tpu.memory_space<vmem>>, vector<1x2x6xf32>
    %34 = vector.shape_cast %33 : vector<1x2x6xf32> to vector<2x6xf32>
    %cst_34 = arith.constant dense<0.000000e+00> : vector<2x96xf32>
    %35 = tpu.matmul %34, %32, %cst_34 {dimension_numbers = #tpu.dot_dimension_numbers<[1], [0], [0], [1], [0, 0, 1, 1], [], []>} : vector<2x6xf32>, vector<6x96xf32>, vector<2x96xf32> -> vector<2x96xf32>
    %c0_35 = arith.constant 0 : index
    %c0_36 = arith.constant 0 : index
    %c0_37 = arith.constant 0 : index
    %36 = vector.load %arg7[%c0_35, %c0_36, %c0_37] : memref<3x96x32xf32, #tpu.memory_space<vmem>>, vector<1x96x32xf32>
    %37 = vector.shape_cast %36 : vector<1x96x32xf32> to vector<96x32xf32>
    %cst_38 = arith.constant dense<0.000000e+00> : vector<2x32xf32>
    %38 = tpu.matmul %35, %37, %cst_38 {dimension_numbers = #tpu.dot_dimension_numbers<[1], [0], [0], [1], [0, 0, 1, 1], [], []>} : vector<2x96xf32>, vector<96x32xf32>, vector<2x32xf32> -> vector<2x32xf32>
    %c1_39 = arith.constant 1 : index
    %c0_40 = arith.constant 0 : index
    %c0_41 = arith.constant 0 : index
    %39 = vector.load %arg6[%c1_39, %c0_40, %c0_41] : memref<3x2x6xf32, #tpu.memory_space<vmem>>, vector<1x2x6xf32>
    %40 = vector.shape_cast %39 : vector<1x2x6xf32> to vector<2x6xf32>
    %cst_42 = arith.constant dense<0.000000e+00> : vector<2x96xf32>
    %41 = tpu.matmul %40, %32, %cst_42 {dimension_numbers = #tpu.dot_dimension_numbers<[1], [0], [0], [1], [0, 0, 1, 1], [], []>} : vector<2x6xf32>, vector<6x96xf32>, vector<2x96xf32> -> vector<2x96xf32>
    %c1_43 = arith.constant 1 : index
    %c0_44 = arith.constant 0 : index
    %c0_45 = arith.constant 0 : index
    %42 = vector.load %arg7[%c1_43, %c0_44, %c0_45] : memref<3x96x32xf32, #tpu.memory_space<vmem>>, vector<1x96x32xf32>
    %43 = vector.shape_cast %42 : vector<1x96x32xf32> to vector<96x32xf32>
    %cst_46 = arith.constant dense<0.000000e+00> : vector<2x32xf32>
    %44 = tpu.matmul %41, %43, %cst_46 {dimension_numbers = #tpu.dot_dimension_numbers<[1], [0], [0], [1], [0, 0, 1, 1], [], []>} : vector<2x96xf32>, vector<96x32xf32>, vector<2x32xf32> -> vector<2x32xf32>
    %45 = arith.addf %38, %44 : vector<2x32xf32>
    %c2_47 = arith.constant 2 : index
    %c0_48 = arith.constant 0 : index
    %c0_49 = arith.constant 0 : index
    %46 = vector.load %arg6[%c2_47, %c0_48, %c0_49] : memref<3x2x6xf32, #tpu.memory_space<vmem>>, vector<1x2x6xf32>
    %47 = vector.shape_cast %46 : vector<1x2x6xf32> to vector<2x6xf32>
    %cst_50 = arith.constant dense<0.000000e+00> : vector<2x96xf32>
    %48 = tpu.matmul %47, %32, %cst_50 {dimension_numbers = #tpu.dot_dimension_numbers<[1], [0], [0], [1], [0, 0, 1, 1], [], []>} : vector<2x6xf32>, vector<6x96xf32>, vector<2x96xf32> -> vector<2x96xf32>
    %c2_51 = arith.constant 2 : index
    %c0_52 = arith.constant 0 : index
    %c0_53 = arith.constant 0 : index
    %49 = vector.load %arg7[%c2_51, %c0_52, %c0_53] : memref<3x96x32xf32, #tpu.memory_space<vmem>>, vector<1x96x32xf32>
    %50 = vector.shape_cast %49 : vector<1x96x32xf32> to vector<96x32xf32>
    %cst_54 = arith.constant dense<0.000000e+00> : vector<2x32xf32>
    %51 = tpu.matmul %48, %50, %cst_54 {dimension_numbers = #tpu.dot_dimension_numbers<[1], [0], [0], [1], [0, 0, 1, 1], [], []>} : vector<2x96xf32>, vector<96x32xf32>, vector<2x32xf32> -> vector<2x32xf32>
    %52 = arith.addf %45, %51 : vector<2x32xf32>
    %c0_55 = arith.constant 0 : index
    %c0_56 = arith.constant 0 : index
    %53 = vector.load %arg8[%c0_55, %c0_56] : memref<1x32xf32, #tpu.memory_space<vmem>>, vector<1x32xf32>
    %54 = vector.broadcast %53 : vector<1x32xf32> to vector<2x32xf32>
    %55 = arith.addf %52, %54 : vector<2x32xf32>
    %cst_57 = arith.constant 0.000000e+00 : f32
    %56 = vector.broadcast %cst_57 : f32 to vector<2x32xf32>
    %57 = arith.maximumf %55, %56 : vector<2x32xf32>
    %c0_58 = arith.constant 0 : index
    %c0_59 = arith.constant 0 : index
    %58 = vector.load %arg9[%c0_58, %c0_59] : memref<32x128xf32, #tpu.memory_space<vmem>>, vector<32x128xf32>
    %cst_60 = arith.constant dense<0.000000e+00> : vector<2x128xf32>
    %59 = tpu.matmul %57, %58, %cst_60 {dimension_numbers = #tpu.dot_dimension_numbers<[1], [0], [0], [1], [0, 0, 1, 1], [], []>} : vector<2x32xf32>, vector<32x128xf32>, vector<2x128xf32> -> vector<2x128xf32>
    %c0_61 = arith.constant 0 : index
    %c0_62 = arith.constant 0 : index
    %60 = vector.load %arg10[%c0_61, %c0_62] : memref<1x128xf32, #tpu.memory_space<vmem>>, vector<1x128xf32>
    %61 = vector.broadcast %60 : vector<1x128xf32> to vector<2x128xf32>
    %62 = arith.addf %59, %61 : vector<2x128xf32>
    %c0_63 = arith.constant 0 : index
    %c0_64 = arith.constant 0 : index
    %63 = vector.load %arg11[%c0_63, %c0_64] : memref<2x128xf32, #tpu.memory_space<vmem>>, vector<2x128xf32>
    tpu.vector_store %arg11[%c0_63, %c0_64], %62 {strides = array<i32>} : memref<2x128xf32, #tpu.memory_space<vmem>>, vector<2x128xf32>,
    return
  }
}

</mosaic_0001>

<bundles_post_ra>
// kernel: rotation_classifier_forward.1
= control target key start
LH: loop header
LB: loop body
LE: loop exit
PB: predicated region body
PF: predicated region fallthrough
CT: control target
= control target key end

     0   :  { %vm62_vm0 = vcmask 1043456   ;;  %vm55_vm1 = vcmask 228352   ;;  %s1407_s0 = inlined_call_operand.vmem [shape: f32[14,28], index: 0, kind: input, shape index: {}]   ;;  %s1408_s1 = inlined_call_operand.vmem [shape: f32[28,224], index: 1, kind: input, shape index: {}]   ;;  %s1409_s2 = inlined_call_operand.vmem [shape: f32[1,224], index: 2, kind: input, shape index: {}]   ;;  %s1410_s3 = inlined_call_operand.vmem [shape: f32[3,6,14], index: 3, kind: input, shape index: {}]   ;;  %s1411_s4 = inlined_call_operand.vmem [shape: f32[3,224,96], index: 4, kind: input, shape index: {}]   ;;  %s1412_s5 = inlined_call_operand.vmem [shape: f32[1,96], index: 5, kind: input, shape index: {}]   ;;  %s1413_s6 = inlined_call_operand.vmem [shape: f32[3,2,6], index: 6, kind: input, shape index: {}]   ;;  %s1414_s7 = inlined_call_operand.vmem [shape: f32[3,96,32], index: 7, kind: input, shape index: {}]   ;;  %s1415_s8 = inlined_call_operand.vmem [shape: f32[1,32], index: 8, kind: input, shape index: {}]   ;;  %s1416_s9 = inlined_call_operand.vmem [shape: f32[32,128], index: 9, kind: input, shape index: {}]   ;;  %s1417_s10 = inlined_call_operand.vmem [shape: f32[1,128], index: 10, kind: input, shape index: {}]   ;;  %s1418_s11 = inlined_call_operand.hbm [shape: f32[2,128], index: 11, kind: output, shape index: {}]  }
   0x1   :  { %v47_v0 = vld [vmem:[%s1408_s1 + $0x30] sm:$0xf]  ;;  %v48_v1 = vld [vmem:[%s1408_s1 + $0x38] sm:$0xf]  ;;  %v45_v2 = vld [vmem:[%s1408_s1 + $0x20] sm:$0xff] }
   0x2   :  { %725 = vmatpush.msk.msra.mxu0 %vm62_vm0, %v47_v0  ;;  %728 = vmatpush.msk.msra.mxu1 %vm62_vm0, %v48_v1  ;;  %v46_v3 = vld [vmem:[%s1408_s1 + $0x28] sm:$0xff]  ;;  %v43_v4 = vld [vmem:[%s1408_s1 + $0x10] sm:$0xff]  ;;  %v44_v5 = vld [vmem:[%s1408_s1 + $0x18] sm:$0xff] }
   0x3   :  { %v41_v6 = vld [vmem:[%s1408_s1] sm:$0xff]  ;;  %v42_v7 = vld [vmem:[%s1408_s1 + $0x8] sm:$0xff] }
   0x4   :  { %82 = vmatpush.msra.mxu0 %v45_v2  ;;  %105 = vmatpush.msra.mxu1 %v46_v3  ;;  %v39_v8 = vld [vmem:[%s1407_s0] sm:$0xff] }
   0x6   :  { %83 = vmatpush.msra.mxu0 %v43_v4  ;;  %106 = vmatpush.msra.mxu1 %v44_v5 }
   0x7   :  { %16 = vsyncpa [#allocation3], 0  ;;  %v40_v9 = vld [vmem:[%s1407_s0 + $0x8] sm:$0x3f]  ;;  %v49_v12 = vld [vmem:[%s1409_s2] sm:$0x3] }
   0x8   :  { %84 = vmatpush.msra.mxu0 %v41_v6  ;;  %107 = vmatpush.msra.mxu1 %v42_v7  ;;  %v51_v13 = vperm.slane %v49_v12, 0  ;;  %v52_v14 = vperm.slane %v49_v12, 1  ;;  %vm124_vm2 = vcmask 1045504   ;;  %v119_v25 = vld [vmem:[%s1410_s3] sm:$0x3f]  ;;  %vm120_vm3 = vcmask 113664  }
   0x9   :  { %726 = vmatmul.msk.f32.vlgmr.msra.gmra.mxu0 %vm55_vm1, %v39_v8  ;;  %729 = vmatmul.msk.f32.vlgmr.msra.gmra.mxu1 %vm55_vm1, %v39_v8  ;;  %v767_v26 = vld [vmem:[%s1411_s4 + $0x1b8] sm:$0xff]  ;;  %v766_v27 = vld [vmem:[%s1411_s4 + $0x1b0] sm:$0xff]  ;;  %v765_v29 = vld [vmem:[%s1411_s4 + $0x1a8] sm:$0xff]  ;;  %vm273_vm4 = vcmask 785408   ;;  %vm485_vm5 = vcmask 48128   ;;  %vm684_vm6 = vcmask 261120  }
   0xa   :  { %301 = vmatpush.msrb.mxu1 %v767_v26  ;;  %v198_v28 = vld [vmem:[%s1411_s4 + $0xd8] sm:$0xff]  ;;  %v754_v32 = vld [vmem:[%s1411_s4 + $0x150] sm:$0xff]  ;;  %v764_v34 = vld [vmem:[%s1411_s4 + $0x1a0] sm:$0xff]  ;;  %s870_s25 = smov [#allocation2]   ;;  %s716_s28 = sshll.u32 %s1418_s11, 4  ;;  %s717_s28 = int_to_ptr.hbm [resolvable:$true] %s716_s28 }
   0xb   :  { %v755_v30 = vld [vmem:[%s1411_s4 + $0x158] sm:$0xff]  ;;  %v197_v33 = vld [vmem:[%s1411_s4 + $0xd0] sm:$0xff]  ;;  %v753_v36 = vld [vmem:[%s1411_s4 + $0x148] sm:$0xff] }
   0xc   :  { %302 = vmatpush.msrb.mxu1 %v766_v27  ;;  %v186_v31 = vld [vmem:[%s1411_s4 + $0x78] sm:$0xff]  ;;  %277 = vmatpush.msrb.mxu0 %v755_v30  ;;  %v185_v35 = vld [vmem:[%s1411_s4 + $0x70] sm:$0xff]  ;;  %v196_v37 = vld [vmem:[%s1411_s4 + $0xc8] sm:$0xff] }
   0xd   :  { %v735_v38 = vld [vmem:[%s1410_s3 + $0x8] sm:$0x3f]  ;;  %v763_v39 = vld [vmem:[%s1411_s4 + $0x198] sm:$0xff]  ;;  %v195_v40 = vld [vmem:[%s1411_s4 + $0xc0] sm:$0xff] }
   0xe   :  { %303 = vmatpush.msrb.mxu1 %v765_v29  ;;  %278 = vmatpush.msrb.mxu0 %v754_v32  ;;  %v184_v41 = vld [vmem:[%s1411_s4 + $0x68] sm:$0xff]  ;;  %v762_v42 = vld [vmem:[%s1411_s4 + $0x190] sm:$0xff]  ;;  %v752_v43 = vld [vmem:[%s1411_s4 + $0x140] sm:$0xff] }
   0xf   :  { %v194_v44 = vld [vmem:[%s1411_s4 + $0xb8] sm:$0xff]  ;;  %v183_v45 = vld [vmem:[%s1411_s4 + $0x60] sm:$0xff]  ;;  %v761_v46 = vld [vmem:[%s1411_s4 + $0x188] sm:$0xff] }
  0x10   :  { %304 = vmatpush.msrb.mxu1 %v764_v34  ;;  %279 = vmatpush.msrb.mxu0 %v753_v36  ;;  %v751_v47 = vld [vmem:[%s1411_s4 + $0x138] sm:$0xff]  ;;  %v193_v48 = vld [vmem:[%s1411_s4 + $0xb0] sm:$0xff]  ;;  %v760_v50 = vld [vmem:[%s1411_s4 + $0x180] sm:$0xff] }
  0x11   :  { %727 = vmatmul.msk.f32.gmra.mxu0 %vm55_vm1, %v40_v9  ;;  %730 = vmatmul.msk.f32.gmra.mxu1 %vm55_vm1, %v40_v9  ;;  %v182_v49 = vld [vmem:[%s1411_s4 + $0x58] sm:$0xff]  ;;  %v750_v51 = vld [vmem:[%s1411_s4 + $0x130] sm:$0xff]  ;;  %v192_v52 = vld [vmem:[%s1411_s4 + $0xa8] sm:$0xff] }
  0x12   :  { %305 = vmatpush.msrb.mxu1 %v763_v39  ;;  %280 = vmatpush.msrb.mxu0 %v752_v43  ;;  %v181_v53 = vld [vmem:[%s1411_s4 + $0x50] sm:$0xff]  ;;  %v759_v54 = vld [vmem:[%s1411_s4 + $0x178] sm:$0xff]  ;;  %v749_v55 = vld [vmem:[%s1411_s4 + $0x128] sm:$0xff] }
  0x13   :  { %v191_v56 = vld [vmem:[%s1411_s4 + $0xa0] sm:$0xff]  ;;  %v180_v57 = vld [vmem:[%s1411_s4 + $0x48] sm:$0xff]  ;;  %v758_v58 = vld [vmem:[%s1411_s4 + $0x170] sm:$0xff] }
  0x14   :  { %306 = vmatpush.msrb.mxu1 %v762_v42  ;;  %281 = vmatpush.msrb.mxu0 %v751_v47  ;;  %v748_v59 = vld [vmem:[%s1411_s4 + $0x120] sm:$0xff]  ;;  %v190_v60 = vld [vmem:[%s1411_s4 + $0x98] sm:$0xff]  ;;  %v757_v62 = vld [vmem:[%s1411_s4 + $0x168] sm:$0xff] }
  0x15   :  { %v179_v61 = vld [vmem:[%s1411_s4 + $0x40] sm:$0xff]  ;;  %v747_v63 = vld [vmem:[%s1411_s4 + $0x118] sm:$0xff]  ;;  %v189_v0 = vld [vmem:[%s1411_s4 + $0x90] sm:$0xff] }
  0x16   :  { %307 = vmatpush.msrb.mxu1 %v761_v46  ;;  %282 = vmatpush.msrb.mxu0 %v750_v51  ;;  %v178_v1 = vld [vmem:[%s1411_s4 + $0x38] sm:$0xff]  ;;  %v756_v2 = vld [vmem:[%s1411_s4 + $0x160] sm:$0xff]  ;;  %v746_v3 = vld [vmem:[%s1411_s4 + $0x110] sm:$0xff] }
  0x17   :  { %v188_v4 = vld [vmem:[%s1411_s4 + $0x88] sm:$0xff]  ;;  %v177_v5 = vld [vmem:[%s1411_s4 + $0x30] sm:$0xff]  ;;  %v187_v7 = vld [vmem:[%s1411_s4 + $0x80] sm:$0xff] }
  0x18   :  { %308 = vmatpush.msrb.mxu1 %v760_v50  ;;  %283 = vmatpush.msrb.mxu0 %v749_v55  ;;  %v745_v6 = vld [vmem:[%s1411_s4 + $0x108] sm:$0xff]  ;;  %v175_v9 = vld [vmem:[%s1411_s4 + $0x20] sm:$0xff]  ;;  %v173_v12 = vld [vmem:[%s1411_s4 + $0x10] sm:$0xff] }
  0x19   :  { %v176_v8 = vld [vmem:[%s1411_s4 + $0x28] sm:$0xff]  ;;  %v783_v26 = vld [vmem:[%s1411_s4 + $0x200] sm:$0xff]  ;;  %v782_v29 = vld [vmem:[%s1411_s4 + $0x1f8] sm:$0xff] }
  0x1a   :  { %309 = vmatpush.msrb.mxu1 %v759_v54  ;;  %284 = vmatpush.msrb.mxu0 %v748_v59  ;;  %v781_v30 = vld [vmem:[%s1411_s4 + $0x1f0] sm:$0xff]  ;;  %v800_v36 = vld [vmem:[%s1411_s4 + $0x288] sm:$0xff]  ;;  %v779_v42 = vld [vmem:[%s1411_s4 + $0x1e0] sm:$0xff] }
  0x1b   :  { %v797_v39 = vld [vmem:[%s1411_s4 + $0x270] sm:$0xff]  ;;  %v795_v43 = vld [vmem:[%s1411_s4 + $0x260] sm:$0xff] }
  0x1c   :  { %310 = vmatpush.msrb.mxu1 %v758_v58  ;;  %285 = vmatpush.msrb.mxu0 %v747_v63  ;;  %v777_v46 = vld [vmem:[%s1411_s4 + $0x1d0] sm:$0xff]  ;;  %v775_v50 = vld [vmem:[%s1411_s4 + $0x1c0] sm:$0xff]  ;;  %v835_v63 = vld [vmem:[%s1414_s7 + $0x108] sm:$0xff] }
  0x1d   :  { %v793_v47 = vld [vmem:[%s1411_s4 + $0x250] sm:$0xff]  ;;  %v791_v51 = vld [vmem:[%s1411_s4 + $0x240] sm:$0xff] }
  0x1e   :  { %311 = vmatpush.msrb.mxu1 %v757_v62  ;;  %286 = vmatpush.msrb.mxu0 %v746_v3  ;;  %v836_v62 = vld [vmem:[%s1414_s7 + $0x110] sm:$0xff] }
  0x1f   :  { %v832_v3 = vld [vmem:[%s1414_s7 + $0xf0] sm:$0xff] }
  0x20   :  { %312 = vmatpush.msrb.mxu1 %v756_v2  ;;  %287 = vmatpush.msrb.mxu0 %v745_v6 }
  0x86   :  { %v86_v10 = vpop.f32.mrf.mxu0  ;;  %v109_v11 = vpop.f32.mrf.mxu1 }
  0x87   :  { %v87_v15 = vadd.f32 %v86_v10, %v51_v13  ;;  %v110_v18 = vadd.f32 %v109_v11, %v52_v14  ;;  %v174_v10 = vld [vmem:[%s1411_s4 + $0x18] sm:$0xff]  ;;  %v744_v11 = vld [vmem:[%s1411_s4 + $0x100] sm:$0xff] }
  0x88   :  { %288 = vmatpush.msrb.mxu0 %v744_v11  ;;  %v484_v11 = vld [vmem:[%s1413_s6] sm:$0x3] }
  0x89   :  { %v964_v21 = vmax.f32 %v87_v15, 0.0  ;;  %v970_v24 = vmax.f32 %v110_v18, 0.0  ;;  %v742_v15 = vld [vmem:[%s1411_s4 + $0xf0] sm:$0xff]  ;;  %v740_v18 = vld [vmem:[%s1411_s4 + $0xe0] sm:$0xff] }
  0x8e   :  { %v89_v16 = vpop.f32.mrf.mxu0  ;;  %v112_v17 = vpop.f32.mrf.mxu1 }
  0x8f   :  { %v90_v19 = vadd.f32 %v89_v16, %v51_v13  ;;  %v113_v20 = vadd.f32 %v112_v17, %v52_v14  ;;  %v743_v13 = vld [vmem:[%s1411_s4 + $0xf8] sm:$0xff]  ;;  %v172_v14 = vld [vmem:[%s1411_s4 + $0x8] sm:$0xff]  ;;  %v171_v16 = vld [vmem:[%s1411_s4] sm:$0xff] }
  0x90   :  { %289 = vmatpush.msrb.mxu0 %v743_v13  ;;  %v741_v17 = vld [vmem:[%s1411_s4 + $0xe8] sm:$0xff]  ;;  %v823_v13 = vld [vmem:[%s1413_s6 + $0x4] sm:$0x3] }
  0x91   :  { %v966_v22 = vmax.f32 %v90_v19, 0.0  ;;  %v968_v23 = vmax.f32 %v113_v20, 0.0  ;;  %v790_v19 = vld [vmem:[%s1411_s4 + $0x238] sm:$0xff]  ;;  %v789_v20 = vld [vmem:[%s1411_s4 + $0x230] sm:$0xff] }
  0x92   :  { %290 = vmatpush.msrb.mxu0 %v742_v15  ;;  %v523_v15 = vld [vmem:[%s1414_s7 + $0x58] sm:$0xff] }
  0x93   :  { %731 = vmatpush.msk.msra.mxu2 %vm124_vm2, %v966_v22  ;;  %733 = vmatpush.msk.msra.mxu3 %vm124_vm2, %v968_v23 }
  0x94   :  { %771 = vmatpush.msk.msra.mxu1 %vm124_vm2, %v966_v22  ;;  %291 = vmatpush.msrb.mxu0 %v741_v17  ;;  %v522_v17 = vld [vmem:[%s1414_s7 + $0x50] sm:$0xff] }
  0x95   :  { %146 = vmatpush.msra.mxu2 %v964_v21  ;;  %166 = vmatpush.msra.mxu3 %v970_v24 }
  0x96   :  { %732 = vmatmul.msk.f32.vlgmr.msra.gmra.mxu2 %vm120_vm3, %v119_v25  ;;  %734 = vmatmul.msk.f32.vlgmr.msra.gmra.mxu3 %vm120_vm3, %v119_v25  ;;  %v784_v25 = vld [vmem:[%s1411_s4 + $0x208] sm:$0xff] }
  0x97   :  { %738 = vmatpush.msk.msrb.mxu3 %vm124_vm2, %v968_v23  ;;  %736 = vmatpush.msk.msrb.mxu2 %vm124_vm2, %v966_v22  ;;  %v787_v22 = vld [vmem:[%s1411_s4 + $0x220] sm:$0xff] }
  0x98   :  { %380 = vmatpush.msra.mxu1 %v964_v21  ;;  %292 = vmatpush.msrb.mxu0 %v740_v18  ;;  %v818_v18 = vld [vmem:[%s1414_s7 + $0xa8] sm:$0xff] }
  0x99   :  { %239 = vmatpush.msrb.mxu3 %v970_v24  ;;  %219 = vmatpush.msrb.mxu2 %v964_v21  ;;  %v788_v21 = vld [vmem:[%s1411_s4 + $0x228] sm:$0xff] }
  0x9a   :  { %437 = vmatpush.msra.mxu0 %v790_v19  ;;  %v521_v19 = vld [vmem:[%s1414_s7 + $0x48] sm:$0xff] }
  0x9b   :  { %344 = vmatpush.msra.mxu3 %v198_v28  ;;  %320 = vmatpush.msra.mxu2 %v186_v31  ;;  %v770_v31 = vld [vmem:[%s1410_s3 + $0x10] sm:$0x3f] }
  0x9c   :  { %438 = vmatpush.msra.mxu0 %v789_v20  ;;  %v817_v20 = vld [vmem:[%s1414_s7 + $0xa0] sm:$0xff] }
  0x9d   :  { %345 = vmatpush.msra.mxu3 %v197_v33  ;;  %321 = vmatpush.msra.mxu2 %v185_v35  ;;  %v802_v33 = vld [vmem:[%s1411_s4 + $0x298] sm:$0xff]  ;;  %v801_v35 = vld [vmem:[%s1411_s4 + $0x290] sm:$0xff] }
  0x9e   :  { %737 = vmatmul.msk.f32.vlgmr.msrb.gmra.mxu2 %vm120_vm3, %v735_v38  ;;  %739 = vmatmul.msk.f32.vlgmr.msrb.gmra.mxu3 %vm120_vm3, %v735_v38  ;;  %v798_v38 = vld [vmem:[%s1411_s4 + $0x278] sm:$0xff] }
  0x9f   :  { %346 = vmatpush.msra.mxu3 %v196_v37  ;;  %322 = vmatpush.msra.mxu2 %v184_v41  ;;  %v799_v37 = vld [vmem:[%s1411_s4 + $0x280] sm:$0xff]  ;;  %v796_v41 = vld [vmem:[%s1411_s4 + $0x268] sm:$0xff] }
  0xa0   :  { %439 = vmatpush.msra.mxu0 %v788_v21  ;;  %v520_v21 = vld [vmem:[%s1414_s7 + $0x40] sm:$0xff] }
  0xa1   :  { %347 = vmatpush.msra.mxu3 %v195_v40  ;;  %323 = vmatpush.msra.mxu2 %v183_v45  ;;  %v780_v40 = vld [vmem:[%s1411_s4 + $0x1e8] sm:$0xff]  ;;  %v794_v45 = vld [vmem:[%s1411_s4 + $0x258] sm:$0xff] }
  0xa2   :  { %440 = vmatpush.msra.mxu0 %v787_v22  ;;  %v816_v22 = vld [vmem:[%s1414_s7 + $0x98] sm:$0xff] }
  0xa3   :  { %348 = vmatpush.msra.mxu3 %v194_v44  ;;  %324 = vmatpush.msra.mxu2 %v182_v49  ;;  %v778_v44 = vld [vmem:[%s1411_s4 + $0x1d8] sm:$0xff]  ;;  %v792_v49 = vld [vmem:[%s1411_s4 + $0x248] sm:$0xff] }
  0xa5   :  { %349 = vmatpush.msra.mxu3 %v193_v48  ;;  %325 = vmatpush.msra.mxu2 %v181_v53  ;;  %v776_v48 = vld [vmem:[%s1411_s4 + $0x1c8] sm:$0xff] }
  0xa7   :  { %350 = vmatpush.msra.mxu3 %v192_v52  ;;  %326 = vmatpush.msra.mxu2 %v180_v57 }
  0xa9   :  { %351 = vmatpush.msra.mxu3 %v191_v56  ;;  %327 = vmatpush.msra.mxu2 %v179_v61  ;;  %v837_v61 = vld [vmem:[%s1414_s7 + $0x118] sm:$0xff] }
  0xab   :  { %352 = vmatpush.msra.mxu3 %v190_v60  ;;  %328 = vmatpush.msra.mxu2 %v178_v1  ;;  %v833_v1 = vld [vmem:[%s1414_s7 + $0xf8] sm:$0xff] }
  0xad   :  { %353 = vmatpush.msra.mxu3 %v189_v0  ;;  %329 = vmatpush.msra.mxu2 %v177_v5  ;;  %v834_v0 = vld [vmem:[%s1414_s7 + $0x100] sm:$0xff]  ;;  %v831_v5 = vld [vmem:[%s1414_s7 + $0xe8] sm:$0xff] }
  0xaf   :  { %354 = vmatpush.msra.mxu3 %v188_v4  ;;  %330 = vmatpush.msra.mxu2 %v176_v8 }
  0xb1   :  { %355 = vmatpush.msra.mxu3 %v187_v7  ;;  %331 = vmatpush.msra.mxu2 %v175_v9  ;;  %v841_v7 = vld [vmem:[%s1412_s5] ss:$0 sm:$0xff] }
  0xb3   :  { %773 = vmatpush.msk.msrb.mxu3 %vm124_vm2, %v968_v23  ;;  %332 = vmatpush.msra.mxu2 %v174_v10  ;;  %v786_v23 = vld [vmem:[%s1411_s4 + $0x218] sm:$0xff] }
  0xb4   :  { %441 = vmatpush.msra.mxu0 %v786_v23  ;;  %v519_v23 = vld [vmem:[%s1414_s7 + $0x38] sm:$0xff] }
  0xb5   :  { %400 = vmatpush.msrb.mxu3 %v970_v24  ;;  %333 = vmatpush.msra.mxu2 %v173_v12  ;;  %v785_v24 = vld [vmem:[%s1411_s4 + $0x210] sm:$0xff]  ;;  %v806_v12 = vld [vmem:[%s1413_s6 + $0x2] sm:$0x3] }
  0xb6   :  { %442 = vmatpush.msra.mxu0 %v785_v24  ;;  %v815_v24 = vld [vmem:[%s1414_s7 + $0x90] sm:$0xff] }
  0xb7   :  { %334 = vmatpush.msra.mxu2 %v172_v14  ;;  %v820_v14 = vld [vmem:[%s1414_s7 + $0xb8] sm:$0xff] }
  0xb8   :  { %443 = vmatpush.msra.mxu0 %v784_v25  ;;  %v518_v25 = vld [vmem:[%s1414_s7 + $0x30] sm:$0xff] }
  0xb9   :  { %335 = vmatpush.msra.mxu2 %v171_v16  ;;  %v819_v16 = vld [vmem:[%s1414_s7 + $0xb0] sm:$0xff] }
  0xba   :  { %444 = vmatpush.msra.mxu0 %v783_v26  ;;  %v814_v26 = vld [vmem:[%s1414_s7 + $0x88] sm:$0xff] }
  0xbc   :  { %445 = vmatpush.msra.mxu0 %v782_v29  ;;  %v516_v29 = vld [vmem:[%s1414_s7 + $0x20] sm:$0xff] }
  0xbe   :  { %446 = vmatpush.msra.mxu0 %v781_v30  ;;  %v812_v30 = vld [vmem:[%s1414_s7 + $0x78] sm:$0xff] }
  0xc0   :  { %447 = vmatpush.msra.mxu0 %v780_v40  ;;  %v828_v40 = vld [vmem:[%s1414_s7 + $0xd0] sm:$0xff] }
  0xc2   :  { %448 = vmatpush.msra.mxu0 %v779_v42  ;;  %v826_v42 = vld [vmem:[%s1414_s7 + $0xc0] sm:$0xff] }
  0xc4   :  { %449 = vmatpush.msra.mxu0 %v778_v44 }
  0xc6   :  { %450 = vmatpush.msra.mxu0 %v777_v46  ;;  %v679_v46 = vld [vmem:[%s1416_s9 + $0x18] sm:$0xff] }
  0xc8   :  { %451 = vmatpush.msra.mxu0 %v776_v48  ;;  %v677_v48 = vld [vmem:[%s1416_s9 + $0x8] sm:$0xff] }
  0xca   :  { %452 = vmatpush.msra.mxu0 %v775_v50 }
 0x119   :  { %v148_v27 = vpop.f32.mrf.mxu2  ;;  %v168_v28 = vpop.f32.mrf.mxu3 }
 0x11a   :  { %769 = vmatmul.msk.f32.vlgmr.msra.gmra.mxu3 %vm273_vm4, %v168_v28  ;;  %336 = vmatmul.f32.vlgmr.msra.gmra.mxu2 %v148_v27  ;;  %v517_v27 = vld [vmem:[%s1414_s7 + $0x28] sm:$0xff]  ;;  %v813_v28 = vld [vmem:[%s1414_s7 + $0x80] sm:$0xff] }
 0x121   :  { %v221_v32 = vpop.f32.mrf.mxu2  ;;  %v241_v34 = vpop.f32.mrf.mxu3 }
 0x122   :  { %293 = vmatmul.f32.vlgmr.msrb.gmra.mxu0 %v221_v32  ;;  %774 = vmatmul.msk.f32.vlgmr.msrb.gmra.mxu3 %vm120_vm3, %v770_v31  ;;  %v811_v32 = vld [vmem:[%s1414_s7 + $0x70] sm:$0xff] }
 0x123   :  { %768 = vmatmul.msk.f32.vlgmr.msrb.gmra.mxu1 %vm273_vm4, %v241_v34  ;;  %653 = vmatpush.msrb.mxu0 %v837_v61  ;;  %v810_v34 = vld [vmem:[%s1414_s7 + $0x68] sm:$0xff] }
 0x124   :  { %461 = vmatpush.msrb.mxu1 %v802_v33  ;;  %v514_v33 = vld [vmem:[%s1414_s7 + $0x10] sm:$0xff] }
 0x125   :  { %654 = vmatpush.msrb.mxu0 %v836_v62 }
 0x126   :  { %462 = vmatpush.msrb.mxu1 %v801_v35  ;;  %v513_v35 = vld [vmem:[%s1414_s7 + $0x8] sm:$0xff] }
 0x127   :  { %655 = vmatpush.msrb.mxu0 %v835_v63 }
 0x128   :  { %463 = vmatpush.msrb.mxu1 %v800_v36  ;;  %v809_v36 = vld [vmem:[%s1414_s7 + $0x60] sm:$0xff] }
 0x129   :  { %656 = vmatpush.msrb.mxu0 %v834_v0 }
 0x12a   :  { %464 = vmatpush.msrb.mxu1 %v799_v37  ;;  %v512_v37 = vld [vmem:[%s1414_s7] sm:$0xff] }
 0x12b   :  { %772 = vmatmul.msk.f32.vlgmr.msra.gmra.mxu1 %vm120_vm3, %v770_v31  ;;  %657 = vmatpush.msrb.mxu0 %v833_v1  ;;  %v515_v31 = vld [vmem:[%s1414_s7 + $0x18] sm:$0xff] }
 0x12c   :  { %465 = vmatpush.msrb.mxu1 %v798_v38  ;;  %v830_v38 = vld [vmem:[%s1414_s7 + $0xe0] sm:$0xff] }
 0x12d   :  { %658 = vmatpush.msrb.mxu0 %v832_v3 }
 0x12e   :  { %466 = vmatpush.msrb.mxu1 %v797_v39  ;;  %v829_v39 = vld [vmem:[%s1414_s7 + $0xd8] sm:$0xff] }
 0x12f   :  { %659 = vmatpush.msrb.mxu0 %v831_v5 }
 0x130   :  { %467 = vmatpush.msrb.mxu1 %v796_v41  ;;  %v827_v41 = vld [vmem:[%s1414_s7 + $0xc8] sm:$0xff] }
 0x131   :  { %660 = vmatpush.msrb.mxu0 %v830_v38 }
 0x132   :  { %468 = vmatpush.msrb.mxu1 %v795_v43 }
 0x133   :  { %661 = vmatpush.msrb.mxu0 %v829_v39 }
 0x134   :  { %469 = vmatpush.msrb.mxu1 %v794_v45 }
 0x135   :  { %662 = vmatpush.msrb.mxu0 %v828_v40 }
 0x136   :  { %470 = vmatpush.msrb.mxu1 %v793_v47  ;;  %v678_v47 = vld [vmem:[%s1416_s9 + $0x10] sm:$0xff] }
 0x137   :  { %663 = vmatpush.msrb.mxu0 %v827_v41 }
 0x138   :  { %471 = vmatpush.msrb.mxu1 %v792_v49  ;;  %v676_v49 = vld [vmem:[%s1416_s9] sm:$0xff]  ;;  %s714_s9 = sshll.u32 %s870_s25, 4  ;;  %s715_s9 = int_to_ptr.vmem [resolvable:$true] %s714_s9 }
 0x139   :  { %664 = vmatpush.msrb.mxu0 %v826_v42 }
 0x13a   :  { %472 = vmatpush.msrb.mxu1 %v791_v51 }
 0x19d   :  { %v357_v52 = vpop.f32.mrf.mxu3  ;;  %v337_v55 = vpop.f32.mrf.mxu2 }
 0x19f   :  { %v294_v53 = vpop.f32.mrf.mxu0 }
 0x1a0   :  { %v314_v54 = vpop.f32.mrf.mxu1 }
 0x1a1   :  { %v315_v56 = vadd.f32 %v314_v54, %v294_v53  ;;  %v842_v54 = vld [vmem:[%s1415_s8] ss:$0 sm:$0xff] }
 0x1a3   :  { %v338_v57 = vadd.f32 %v337_v55, %v315_v56 }
 0x1a5   :  { %v358_v58 = vadd.f32 %v357_v52, %v338_v57  ;;  %v402_v59 = vpop.f32.mrf.mxu3 }
 0x1a6   :  { %803 = vmatmul.msk.f32.vlgmr.msrb.gmra.mxu1 %vm273_vm4, %v402_v59 }
 0x1a8   :  { %v382_v60 = vpop.f32.mrf.mxu1 }
 0x1a9   :  { %453 = vmatmul.f32.vlgmr.msra.gmra.mxu0 %v382_v60 }
 0x223   :  { %v474_v2 = vpop.f32.mrf.mxu1 }
 0x226   :  { %v454_v4 = vpop.f32.mrf.mxu0 }
 0x227   :  { %v475_v6 = vadd.f32 %v474_v2, %v454_v4 }
 0x229   :  { %v477_v8 = vadd.f32 %v475_v6, %v358_v58  ;;  %v843_v58 = vld [vmem:[%s1417_s10] ss:$0 sm:$0xff] }
 0x22b   :  { %v482_v9 = vadd.f32 %v841_v7, %v477_v8 }
 0x22d   :  { %v483_v10 = vmax.f32 %v482_v9, 0.0 }
 0x22f   :  { %804 = vmatpush.msk.msrb.mxu2 %vm124_vm2, %v483_v10  ;;  %807 = vmatpush.msk.msra.mxu3 %vm124_vm2, %v483_v10 }
 0x230   :  { %824 = vmatpush.msk.msra.mxu1 %vm124_vm2, %v483_v10  ;;  %805 = vmatmul.msk.f32.vlgmr.msrb.gmra.mxu2 %vm485_vm5, %v484_v11 }
 0x231   :  { %808 = vmatmul.msk.f32.vlgmr.msra.gmra.mxu3 %vm485_vm5, %v806_v12  ;;  %825 = vmatmul.msk.f32.vlgmr.msra.gmra.mxu1 %vm485_vm5, %v823_v13 }
 0x232   :  { %569 = vmatpush.msra.mxu2 %v820_v14  ;;  %592 = vmatpush.msrb.mxu3 %v523_v15 }
 0x233   :  { %700 = vmatpush.msrb.mxu1 %v679_v46 }
 0x234   :  { %570 = vmatpush.msra.mxu2 %v819_v16  ;;  %593 = vmatpush.msrb.mxu3 %v522_v17 }
 0x235   :  { %701 = vmatpush.msrb.mxu1 %v678_v47 }
 0x236   :  { %571 = vmatpush.msra.mxu2 %v818_v18  ;;  %594 = vmatpush.msrb.mxu3 %v521_v19 }
 0x237   :  { %702 = vmatpush.msrb.mxu1 %v677_v48 }
 0x238   :  { %572 = vmatpush.msra.mxu2 %v817_v20  ;;  %595 = vmatpush.msrb.mxu3 %v520_v21 }
 0x239   :  { %703 = vmatpush.msrb.mxu1 %v676_v49 }
 0x23a   :  { %573 = vmatpush.msra.mxu2 %v816_v22  ;;  %596 = vmatpush.msrb.mxu3 %v519_v23 }
 0x23c   :  { %574 = vmatpush.msra.mxu2 %v815_v24  ;;  %597 = vmatpush.msrb.mxu3 %v518_v25 }
 0x23e   :  { %575 = vmatpush.msra.mxu2 %v814_v26  ;;  %598 = vmatpush.msrb.mxu3 %v517_v27 }
 0x240   :  { %576 = vmatpush.msra.mxu2 %v813_v28  ;;  %599 = vmatpush.msrb.mxu3 %v516_v29 }
 0x242   :  { %577 = vmatpush.msra.mxu2 %v812_v30  ;;  %600 = vmatpush.msrb.mxu3 %v515_v31 }
 0x244   :  { %578 = vmatpush.msra.mxu2 %v811_v32  ;;  %601 = vmatpush.msrb.mxu3 %v514_v33 }
 0x246   :  { %579 = vmatpush.msra.mxu2 %v810_v34  ;;  %602 = vmatpush.msrb.mxu3 %v513_v35 }
 0x248   :  { %580 = vmatpush.msra.mxu2 %v809_v36  ;;  %603 = vmatpush.msrb.mxu3 %v512_v37 }
 0x2ae   :  { %v630_v43 = vpop.f32.mrf.mxu1 }
 0x2af   :  { %838 = vmatmul.msk.f32.vlgmr.msrb.gmra.mxu0 %vm273_vm4, %v630_v43 }
 0x2b3   :  { %v509_v44 = vpop.f32.mrf.mxu2 }
 0x2b4   :  { %v546_v45 = vpop.f32.mrf.mxu3  ;;  %822 = vmatmul.msk.f32.vlgmr.msrb.gmra.mxu3 %vm273_vm4, %v509_v44 }
 0x2b5   :  { %821 = vmatmul.msk.f32.vlgmr.msra.gmra.mxu2 %vm273_vm4, %v546_v45 }
 0x32c   :  { %v666_v52 = vpop.f32.mrf.mxu0 }
 0x337   :  { %v605_v50 = vpop.f32.mrf.mxu3 }
 0x338   :  { %v582_v51 = vpop.f32.mrf.mxu2 }
 0x339   :  { %v606_v53 = vadd.f32 %v605_v50, %v582_v51 }
 0x33b   :  { %v669_v55 = vadd.f32 %v666_v52, %v606_v53 }
 0x33d   :  { %v674_v56 = vadd.f32 %v842_v54, %v669_v55 }
 0x33f   :  { %v675_v57 = vmax.f32 %v674_v56, 0.0 }
 0x341   :  { %839 = vmatmul.msk.f32.vlgmr.msrb.gmra.mxu1 %vm684_vm6, %v675_v57 }
 0x3be   :  { %v705_v59 = vpop.f32.mrf.mxu1 }
 0x3bf   :  { %v706_v60 = vadd.f32 %v843_v58, %v705_v59 }
 0x3c1   :  { %708 = vst [vmem:[#allocation2] sm:$0x3] %v706_v60 }
 0x3c2   :  { %719 = dma.vmem_to_hbm [thread:$0]  %s715_s9, 32, %s717_s28, [#allocation3]  }
 0x3c3   :  { %868 = dma.done.wait [#allocation3], 32  }
 0x3c4   :  { %869 = vsyncadd [#allocation3], 4294967264 }
 0x3c5   :  { %724 = vsyncpa [#allocation3], 1 }

</bundles_post_ra>
